<compile_context>
chip_gen: v6e
topology: v6e:2x2x1
jax: 0.10.0
libtpu: 0.0.40
codegen_flags: <defaults>
</compile_context>

<pallas_src>
import functools

import jax
import jax.numpy as jnp
from jax.experimental import pallas as pl
from jax.experimental.pallas import tpu as pltpu


def self_attention_kernel(x_ref, wqkv_ref, wu_ref, o_ref, *, heads):
    Bb, T, K = x_ref.shape
    HK = heads * K

    # Flatten the batch block: the wide QKV projection presents Bb*T rows to
    # the MXU instead of T rows per batch element.
    x = x_ref[...].reshape(Bb * T, K).astype(jnp.bfloat16)
    wqkv = wqkv_ref[...]                          # (K, 3*H*K) bf16, Q/K scale pre-folded
    wu = wu_ref[...]                              # (H*K, K)   bf16 (unify^T)

    # One wide lane-dense projection, f32 accumulation.
    qkv = jnp.dot(x, wqkv, preferred_element_type=jnp.float32)   # (Bb*T, 3*HK)
    # Single slab cast, hoisted out of the head loop.
    qkv_bf = qkv.astype(jnp.bfloat16)

    attn_heads = []
    # TODO(synk): at production head_dim (multiple of 128, head-major stacked
    # weights) replace this unrolled loop with a head-batched lax.dot_general;
    # at H=4, K=16 the unroll is cheap and keeps the proven 'bqd,bkd->bqk' form.
    for h in range(heads):
        q_h = qkv_bf[:, h * K:(h + 1) * K].reshape(Bb, T, K)
        k_h = qkv_bf[:, HK + h * K:HK + (h + 1) * K].reshape(Bb, T, K)
        v_h = qkv_bf[:, 2 * HK + h * K:2 * HK + (h + 1) * K].reshape(Bb, T, K)

        # (Bb, T, T) scores: contract last dims, batch over Bb, no transposes.
        s = jnp.einsum('bqd,bkd->bqk', q_h, k_h,
                       preferred_element_type=jnp.float32)
        # Numerically stable softmax in f32; reciprocal goes to the EUP slot.
        s = s - jnp.max(s, axis=-1, keepdims=True)
        p = jnp.exp(s)
        p = p * pl.reciprocal(jnp.sum(p, axis=-1, keepdims=True), approx=True)

        attn_h = jnp.einsum('bqk,bkd->bqd', p.astype(jnp.bfloat16), v_h,
                            preferred_element_type=jnp.float32)  # (Bb, T, K)
        attn_heads.append(attn_h)

    # Fused unify: ONE (Bb*T, HK) x (HK, K) contraction replaces H tiny
    # per-head matmuls + serial f32 adds (MXU accumulates the HK contraction).
    attn_all = jnp.concatenate(attn_heads, axis=-1)              # (Bb, T, HK) f32
    attn_all = attn_all.reshape(Bb * T, HK).astype(jnp.bfloat16)
    out = jnp.dot(attn_all, wu, preferred_element_type=jnp.float32)  # (Bb*T, K)

    o_ref[...] = out.reshape(Bb, T, K)            # single store per grid step


def self_attention_pallas(x, Wq, Wk, Wv, Wu, heads, *, batch_block=None):
    """x: (B, T, K); Wq/Wk/Wv: (heads*K, K); Wu: (K, heads*K). Returns (B, T, K)."""
    B, T, K = x.shape
    H = heads
    HK = H * K

    if batch_block is None:
        # Default keeps >=2 grid blocks so v7x's second TensorCore has work.
        # On single-TC v5e/v6e, pass batch_block=B for a 1-step grid and
        # maximum MXU row fill.
        batch_block = B // 2 if (B >= 2 and B % 2 == 0) else 1
    assert B % batch_block == 0, "batch_block must divide the batch size"
    num_blocks = B // batch_block

    # Wrapper-side layout plumbing (no in-kernel transposes / scale multiplies):
    #   - transpose each nn.Linear weight so the kernel contracts directly,
    #   - fold the dim**-0.25 scale of Q and K into their weights,
    #   - stack Q/K/V into one (K, 3*H*K) matrix -> one wide lane-dense matmul,
    #   - cast weights to bf16 once (halves weight DMA; f32 accumulation in-kernel).
    scale = 1.0 / (float(K) ** 0.25)
    Wq_t = Wq.T * scale                                   # (K, H*K)
    Wk_t = Wk.T * scale                                   # (K, H*K)
    Wv_t = Wv.T                                           # (K, H*K)
    Wqkv_t = jnp.concatenate([Wq_t, Wk_t, Wv_t], axis=1).astype(jnp.bfloat16)
    Wu_t = Wu.T.astype(jnp.bfloat16)                      # (H*K, K), head-major rows

    kernel = functools.partial(self_attention_kernel, heads=H)

    return pl.pallas_call(
        kernel,
        out_shape=jax.ShapeDtypeStruct((B, T, K), jnp.float32),
        grid_spec=pltpu.PrefetchScalarGridSpec(
            num_scalar_prefetch=0,
            grid=(num_blocks,),
            in_specs=[
                pl.BlockSpec((batch_block, T, K), lambda b: (b, 0, 0)),  # x block
                pl.BlockSpec((K, 3 * HK), lambda b: (0, 0)),   # stacked QKV weight (resident)
                pl.BlockSpec((HK, K), lambda b: (0, 0)),       # unify^T weight (resident)
            ],
            out_specs=pl.BlockSpec((batch_block, T, K), lambda b: (b, 0, 0)),
        ),
        compiler_params=pltpu.CompilerParams(
            dimension_semantics=("parallel",),   # batch-parallel -> both v7x TCs busy
        ),
    )(x, Wqkv_t, Wu_t)


def self_attention_reference(x, Wq, Wk, Wv, Wu, heads):
    """Pure-JAX (f32) mirror of the PyTorch forward, for verification."""
    b, t, k = x.shape
    h = heads
    Q = (x @ Wq.T).reshape(b, t, h, k).transpose(0, 2, 1, 3)
    Kp = (x @ Wk.T).reshape(b, t, h, k).transpose(0, 2, 1, 3)
    V = (x @ Wv.T).reshape(b, t, h, k).transpose(0, 2, 1, 3)
    Q = Q / (k ** 0.25)
    Kp = Kp / (k ** 0.25)
    dot = jnp.einsum("bhtd,bhsd->bhts", Q, Kp)
    dot = jax.nn.softmax(dot, axis=-1)
    out = jnp.einsum("bhts,bhsd->bhtd", dot, V)
    out = out.transpose(0, 2, 1, 3).reshape(b, t, h * k)
    return out @ Wu.T


if __name__ == "__main__":
    B, T, DIM, HEADS = 2, 8, 16, 4

    key = jax.random.PRNGKey(0)
    kx, kq, kk, kv, ku = jax.random.split(key, 5)

    x = jax.random.normal(kx, (B, T, DIM), dtype=jnp.float32)
    # Weights use nn.Linear layout: (out_features, in_features), bias=False.
    Wq = jax.random.normal(kq, (DIM * HEADS, DIM), dtype=jnp.float32) * 0.1
    Wk = jax.random.normal(kk, (DIM * HEADS, DIM), dtype=jnp.float32) * 0.1
    Wv = jax.random.normal(kv, (DIM * HEADS, DIM), dtype=jnp.float32) * 0.1
    Wu = jax.random.normal(ku, (DIM, DIM * HEADS), dtype=jnp.float32) * 0.1

    out = self_attention_pallas(x, Wq, Wk, Wv, Wu, HEADS)
    out = jax.block_until_ready(out)

    ref = self_attention_reference(x, Wq, Wk, Wv, Wu, HEADS)
    assert out.shape == (B, T, DIM)
    # Tolerance accounts for bf16 MXU inputs (f32 accumulation) and the approx
    # EUP reciprocal on the softmax denominator; switch both to exact/f32 if
    # tighter accuracy is ever required (negligible cost at these sizes).
    assert jnp.allclose(out, ref, rtol=2e-2, atol=2e-2), "Pallas kernel mismatch vs reference"

    print("KERNEL_OK")
</pallas_src>

<mosaic_0001>
module attributes {stable_mosaic.version = 11 : i64} {
  func.func @self_attention_kernel(%arg0: i32, %arg1: memref<1x8x16xf32, #tpu.memory_space<vmem>>, %arg2: memref<16x192xbf16, #tpu.memory_space<vmem>>, %arg3: memref<64x16xbf16, #tpu.memory_space<vmem>>, %arg4: memref<1x8x16xf32, #tpu.memory_space<vmem>>) attributes {dimension_semantics = [#tpu.dimension_semantics<parallel>], iteration_bounds = array<i64: 2>, scalar_prefetch = 0 : i64, scratch_operands = 0 : i64, tpu.core_type = #tpu.core_type<tc>, window_params = [{transform_indices = @transform_0, window_bounds = array<i64: 1, 8, 16>}, {pipeline_mode = #tpu.pipeline_mode<synchronous>, transform_indices = @transform_1, window_bounds = array<i64: 16, 192>}, {pipeline_mode = #tpu.pipeline_mode<synchronous>, transform_indices = @transform_2, window_bounds = array<i64: 64, 16>}, {transform_indices = @transform_3, window_bounds = array<i64: 1, 8, 16>}]} {
    %c0 = arith.constant 0 : index
    %c0_0 = arith.constant 0 : index
    %c0_1 = arith.constant 0 : index
    %0 = vector.load %arg1[%c0, %c0_0, %c0_1] : memref<1x8x16xf32, #tpu.memory_space<vmem>>, vector<1x8x16xf32>
    %1 = vector.shape_cast %0 : vector<1x8x16xf32> to vector<8x16xf32>
    %2 = arith.truncf %1 : vector<8x16xf32> to vector<8x16xbf16>
    %c0_2 = arith.constant 0 : index
    %c0_3 = arith.constant 0 : index
    %3 = vector.load %arg2[%c0_2, %c0_3] : memref<16x192xbf16, #tpu.memory_space<vmem>>, vector<16x192xbf16>
    %c0_4 = arith.constant 0 : index
    %c0_5 = arith.constant 0 : index
    %4 = vector.load %arg3[%c0_4, %c0_5] : memref<64x16xbf16, #tpu.memory_space<vmem>>, vector<64x16xbf16>
    %cst = arith.constant dense<0.000000e+00> : vector<8x192xf32>
    %5 = tpu.matmul %2, %3, %cst {dimension_numbers = #tpu.dot_dimension_numbers<[1], [0], [0], [1], [0, 0, 1, 1], [], []>} : vector<8x16xbf16>, vector<16x192xbf16>, vector<8x192xf32> -> vector<8x192xf32>
    %6 = arith.truncf %5 : vector<8x192xf32> to vector<8x192xbf16>
    %7 = vector.extract_strided_slice %6 {offsets = [0, 0], sizes = [8, 16], strides = [1, 1]} : vector<8x192xbf16> to vector<8x16xbf16>
    %8 = vector.shape_cast %7 : vector<8x16xbf16> to vector<1x8x16xbf16>
    %9 = vector.extract_strided_slice %6 {offsets = [0, 64], sizes = [8, 16], strides = [1, 1]} : vector<8x192xbf16> to vector<8x16xbf16>
    %10 = vector.shape_cast %9 : vector<8x16xbf16> to vector<1x8x16xbf16>
    %11 = vector.extract_strided_slice %6 {offsets = [0, 128], sizes = [8, 16], strides = [1, 1]} : vector<8x192xbf16> to vector<8x16xbf16>
    %12 = vector.shape_cast %11 : vector<8x16xbf16> to vector<1x8x16xbf16>
    "tpu.trace_start"() <{level = 10 : i32, message = "bqd,bkd->bqk"}> : () -> ()
    %cst_6 = arith.constant dense<0.000000e+00> : vector<1x8x8xf32>
    %13 = tpu.matmul %8, %10, %cst_6 {dimension_numbers = #tpu.dot_dimension_numbers<[2], [2], [1], [1], [0, 0, 0, 1, 1, 1], [0], [0]>} : vector<1x8x16xbf16>, vector<1x8x16xbf16>, vector<1x8x8xf32> -> vector<1x8x8xf32>
    "tpu.trace_stop"() : () -> ()
    %cst_7 = arith.constant dense<0xFF800000> : vector<1x8xf32>
    %14 = vector.multi_reduction <maximumf>, %13, %cst_7 [2] : vector<1x8x8xf32> to vector<1x8xf32>
    %15 = vector.shape_cast %14 : vector<1x8xf32> to vector<1x8x1xf32>
    %16 = vector.broadcast %15 : vector<1x8x1xf32> to vector<1x8x8xf32>
    %17 = arith.subf %13, %16 : vector<1x8x8xf32>
    %18 = math.exp %17 : vector<1x8x8xf32>
    %cst_8 = arith.constant dense<0.000000e+00> : vector<1x8xf32>
    %19 = vector.multi_reduction <add>, %18, %cst_8 [2] : vector<1x8x8xf32> to vector<1x8xf32>
    %20 = vector.shape_cast %19 : vector<1x8xf32> to vector<1x8x1xf32>
    %21 = tpu.reciprocal %20 {approx = true} : vector<1x8x1xf32> -> vector<1x8x1xf32>
    %22 = vector.broadcast %21 : vector<1x8x1xf32> to vector<1x8x8xf32>
    %23 = arith.mulf %18, %22 : vector<1x8x8xf32>
    %24 = arith.truncf %23 : vector<1x8x8xf32> to vector<1x8x8xbf16>
    "tpu.trace_start"() <{level = 10 : i32, message = "bqk,bkd->bqd"}> : () -> ()
    %cst_9 = arith.constant dense<0.000000e+00> : vector<1x8x16xf32>
    %25 = tpu.matmul %24, %12, %cst_9 {dimension_numbers = #tpu.dot_dimension_numbers<[2], [1], [1], [2], [0, 0, 0, 1, 1, 2], [0], [0]>} : vector<1x8x8xbf16>, vector<1x8x16xbf16>, vector<1x8x16xf32> -> vector<1x8x16xf32>
    "tpu.trace_stop"() : () -> ()
    %26 = vector.extract_strided_slice %6 {offsets = [0, 16], sizes = [8, 16], strides = [1, 1]} : vector<8x192xbf16> to vector<8x16xbf16>
    %27 = vector.shape_cast %26 : vector<8x16xbf16> to vector<1x8x16xbf16>
    %28 = vector.extract_strided_slice %6 {offsets = [0, 80], sizes = [8, 16], strides = [1, 1]} : vector<8x192xbf16> to vector<8x16xbf16>
    %29 = vector.shape_cast %28 : vector<8x16xbf16> to vector<1x8x16xbf16>
    %30 = vector.extract_strided_slice %6 {offsets = [0, 144], sizes = [8, 16], strides = [1, 1]} : vector<8x192xbf16> to vector<8x16xbf16>
    %31 = vector.shape_cast %30 : vector<8x16xbf16> to vector<1x8x16xbf16>
    "tpu.trace_start"() <{level = 10 : i32, message = "bqd,bkd->bqk"}> : () -> ()
    %cst_10 = arith.constant dense<0.000000e+00> : vector<1x8x8xf32>
    %32 = tpu.matmul %27, %29, %cst_10 {dimension_numbers = #tpu.dot_dimension_numbers<[2], [2], [1], [1], [0, 0, 0, 1, 1, 1], [0], [0]>} : vector<1x8x16xbf16>, vector<1x8x16xbf16>, vector<1x8x8xf32> -> vector<1x8x8xf32>
    "tpu.trace_stop"() : () -> ()
    %cst_11 = arith.constant dense<0xFF800000> : vector<1x8xf32>
    %33 = vector.multi_reduction <maximumf>, %32, %cst_11 [2] : vector<1x8x8xf32> to vector<1x8xf32>
    %34 = vector.shape_cast %33 : vector<1x8xf32> to vector<1x8x1xf32>
    %35 = vector.broadcast %34 : vector<1x8x1xf32> to vector<1x8x8xf32>
    %36 = arith.subf %32, %35 : vector<1x8x8xf32>
    %37 = math.exp %36 : vector<1x8x8xf32>
    %cst_12 = arith.constant dense<0.000000e+00> : vector<1x8xf32>
    %38 = vector.multi_reduction <add>, %37, %cst_12 [2] : vector<1x8x8xf32> to vector<1x8xf32>
    %39 = vector.shape_cast %38 : vector<1x8xf32> to vector<1x8x1xf32>
    %40 = tpu.reciprocal %39 {approx = true} : vector<1x8x1xf32> -> vector<1x8x1xf32>
    %41 = vector.broadcast %40 : vector<1x8x1xf32> to vector<1x8x8xf32>
    %42 = arith.mulf %37, %41 : vector<1x8x8xf32>
    %43 = arith.truncf %42 : vector<1x8x8xf32> to vector<1x8x8xbf16>
    "tpu.trace_start"() <{level = 10 : i32, message = "bqk,bkd->bqd"}> : () -> ()
    %cst_13 = arith.constant dense<0.000000e+00> : vector<1x8x16xf32>
    %44 = tpu.matmul %43, %31, %cst_13 {dimension_numbers = #tpu.dot_dimension_numbers<[2], [1], [1], [2], [0, 0, 0, 1, 1, 2], [0], [0]>} : vector<1x8x8xbf16>, vector<1x8x16xbf16>, vector<1x8x16xf32> -> vector<1x8x16xf32>
    "tpu.trace_stop"() : () -> ()
    %45 = vector.extract_strided_slice %6 {offsets = [0, 32], sizes = [8, 16], strides = [1, 1]} : vector<8x192xbf16> to vector<8x16xbf16>
    %46 = vector.shape_cast %45 : vector<8x16xbf16> to vector<1x8x16xbf16>
    %47 = vector.extract_strided_slice %6 {offsets = [0, 96], sizes = [8, 16], strides = [1, 1]} : vector<8x192xbf16> to vector<8x16xbf16>
    %48 = vector.shape_cast %47 : vector<8x16xbf16> to vector<1x8x16xbf16>
    %49 = vector.extract_strided_slice %6 {offsets = [0, 160], sizes = [8, 16], strides = [1, 1]} : vector<8x192xbf16> to vector<8x16xbf16>
    %50 = vector.shape_cast %49 : vector<8x16xbf16> to vector<1x8x16xbf16>
    "tpu.trace_start"() <{level = 10 : i32, message = "bqd,bkd->bqk"}> : () -> ()
    %cst_14 = arith.constant dense<0.000000e+00> : vector<1x8x8xf32>
    %51 = tpu.matmul %46, %48, %cst_14 {dimension_numbers = #tpu.dot_dimension_numbers<[2], [2], [1], [1], [0, 0, 0, 1, 1, 1], [0], [0]>} : vector<1x8x16xbf16>, vector<1x8x16xbf16>, vector<1x8x8xf32> -> vector<1x8x8xf32>
    "tpu.trace_stop"() : () -> ()
    %cst_15 = arith.constant dense<0xFF800000> : vector<1x8xf32>
    %52 = vector.multi_reduction <maximumf>, %51, %cst_15 [2] : vector<1x8x8xf32> to vector<1x8xf32>
    %53 = vector.shape_cast %52 : vector<1x8xf32> to vector<1x8x1xf32>
    %54 = vector.broadcast %53 : vector<1x8x1xf32> to vector<1x8x8xf32>
    %55 = arith.subf %51, %54 : vector<1x8x8xf32>
    %56 = math.exp %55 : vector<1x8x8xf32>
    %cst_16 = arith.constant dense<0.000000e+00> : vector<1x8xf32>
    %57 = vector.multi_reduction <add>, %56, %cst_16 [2] : vector<1x8x8xf32> to vector<1x8xf32>
    %58 = vector.shape_cast %57 : vector<1x8xf32> to vector<1x8x1xf32>
    %59 = tpu.reciprocal %58 {approx = true} : vector<1x8x1xf32> -> vector<1x8x1xf32>
    %60 = vector.broadcast %59 : vector<1x8x1xf32> to vector<1x8x8xf32>
    %61 = arith.mulf %56, %60 : vector<1x8x8xf32>
    %62 = arith.truncf %61 : vector<1x8x8xf32> to vector<1x8x8xbf16>
    "tpu.trace_start"() <{level = 10 : i32, message = "bqk,bkd->bqd"}> : () -> ()
    %cst_17 = arith.constant dense<0.000000e+00> : vector<1x8x16xf32>
    %63 = tpu.matmul %62, %50, %cst_17 {dimension_numbers = #tpu.dot_dimension_numbers<[2], [1], [1], [2], [0, 0, 0, 1, 1, 2], [0], [0]>} : vector<1x8x8xbf16>, vector<1x8x16xbf16>, vector<1x8x16xf32> -> vector<1x8x16xf32>
    "tpu.trace_stop"() : () -> ()
    %64 = vector.extract_strided_slice %6 {offsets = [0, 48], sizes = [8, 16], strides = [1, 1]} : vector<8x192xbf16> to vector<8x16xbf16>
    %65 = vector.shape_cast %64 : vector<8x16xbf16> to vector<1x8x16xbf16>
    %66 = vector.extract_strided_slice %6 {offsets = [0, 112], sizes = [8, 16], strides = [1, 1]} : vector<8x192xbf16> to vector<8x16xbf16>
    %67 = vector.shape_cast %66 : vector<8x16xbf16> to vector<1x8x16xbf16>
    %68 = vector.extract_strided_slice %6 {offsets = [0, 176], sizes = [8, 16], strides = [1, 1]} : vector<8x192xbf16> to vector<8x16xbf16>
    %69 = vector.shape_cast %68 : vector<8x16xbf16> to vector<1x8x16xbf16>
    "tpu.trace_start"() <{level = 10 : i32, message = "bqd,bkd->bqk"}> : () -> ()
    %cst_18 = arith.constant dense<0.000000e+00> : vector<1x8x8xf32>
    %70 = tpu.matmul %65, %67, %cst_18 {dimension_numbers = #tpu.dot_dimension_numbers<[2], [2], [1], [1], [0, 0, 0, 1, 1, 1], [0], [0]>} : vector<1x8x16xbf16>, vector<1x8x16xbf16>, vector<1x8x8xf32> -> vector<1x8x8xf32>
    "tpu.trace_stop"() : () -> ()
    %cst_19 = arith.constant dense<0xFF800000> : vector<1x8xf32>
    %71 = vector.multi_reduction <maximumf>, %70, %cst_19 [2] : vector<1x8x8xf32> to vector<1x8xf32>
    %72 = vector.shape_cast %71 : vector<1x8xf32> to vector<1x8x1xf32>
    %73 = vector.broadcast %72 : vector<1x8x1xf32> to vector<1x8x8xf32>
    %74 = arith.subf %70, %73 : vector<1x8x8xf32>
    %75 = math.exp %74 : vector<1x8x8xf32>
    %cst_20 = arith.constant dense<0.000000e+00> : vector<1x8xf32>
    %76 = vector.multi_reduction <add>, %75, %cst_20 [2] : vector<1x8x8xf32> to vector<1x8xf32>
    %77 = vector.shape_cast %76 : vector<1x8xf32> to vector<1x8x1xf32>
    %78 = tpu.reciprocal %77 {approx = true} : vector<1x8x1xf32> -> vector<1x8x1xf32>
    %79 = vector.broadcast %78 : vector<1x8x1xf32> to vector<1x8x8xf32>
    %80 = arith.mulf %75, %79 : vector<1x8x8xf32>
    %81 = arith.truncf %80 : vector<1x8x8xf32> to vector<1x8x8xbf16>
    "tpu.trace_start"() <{level = 10 : i32, message = "bqk,bkd->bqd"}> : () -> ()
    %cst_21 = arith.constant dense<0.000000e+00> : vector<1x8x16xf32>
    %82 = tpu.matmul %81, %69, %cst_21 {dimension_numbers = #tpu.dot_dimension_numbers<[2], [1], [1], [2], [0, 0, 0, 1, 1, 2], [0], [0]>} : vector<1x8x8xbf16>, vector<1x8x16xbf16>, vector<1x8x16xf32> -> vector<1x8x16xf32>
    "tpu.trace_stop"() : () -> ()
    %83 = tpu.concatenate %25, %44, %63, %82 in 2 : vector<1x8x16xf32>, vector<1x8x16xf32>, vector<1x8x16xf32>, vector<1x8x16xf32> -> vector<1x8x64xf32>
    %84 = vector.shape_cast %83 : vector<1x8x64xf32> to vector<8x64xf32>
    %85 = arith.truncf %84 : vector<8x64xf32> to vector<8x64xbf16>
    %cst_22 = arith.constant dense<0.000000e+00> : vector<8x16xf32>
    %86 = tpu.matmul %85, %4, %cst_22 {dimension_numbers = #tpu.dot_dimension_numbers<[1], [0], [0], [1], [0, 0, 1, 1], [], []>} : vector<8x64xbf16>, vector<64x16xbf16>, vector<8x16xf32> -> vector<8x16xf32>
    %87 = vector.shape_cast %86 : vector<8x16xf32> to vector<1x8x16xf32>
    %c0_23 = arith.constant 0 : index
    %c0_24 = arith.constant 0 : index
    %c0_25 = arith.constant 0 : index
    %88 = vector.load %arg4[%c0_23, %c0_24, %c0_25] : memref<1x8x16xf32, #tpu.memory_space<vmem>>, vector<1x8x16xf32>
    tpu.vector_store %arg4[%c0_23, %c0_24, %c0_25], %87 {strides = array<i32>} : memref<1x8x16xf32, #tpu.memory_space<vmem>>, vector<1x8x16xf32>,
    return
  }
  func.func @transform_0(%arg0: i32) -> (i32, i32, i32) {
    %c0_i32 = arith.constant 0 : i32
    %c0_i32_0 = arith.constant 0 : i32
    %c0_i32_1 = arith.constant 0 : i32
    return %arg0, %c0_i32, %c0_i32_0 : i32, i32, i32
  }
  func.func @transform_1(%arg0: i32) -> (i32, i32) {
    %c0_i32 = arith.constant 0 : i32
    %c0_i32_0 = arith.constant 0 : i32
    %c0_i32_1 = arith.constant 0 : i32
    return %c0_i32, %c0_i32_0 : i32, i32
  }
  func.func @transform_2(%arg0: i32) -> (i32, i32) {
    %c0_i32 = arith.constant 0 : i32
    %c0_i32_0 = arith.constant 0 : i32
    %c0_i32_1 = arith.constant 0 : i32
    return %c0_i32, %c0_i32_0 : i32, i32
  }
  func.func @transform_3(%arg0: i32) -> (i32, i32, i32) {
    %c0_i32 = arith.constant 0 : i32
    %c0_i32_0 = arith.constant 0 : i32
    %c0_i32_1 = arith.constant 0 : i32
    return %arg0, %c0_i32, %c0_i32_0 : i32, i32, i32
  }
}

</mosaic_0001>

<bundles_post_ra>
// kernel: tpu_custom_call.1
= control target key start
LH: loop header
LB: loop body
LE: loop exit
PB: predicated region body
PF: predicated region fallthrough
CT: control target
= control target key end

     0   :  { %8 = vsyncpa [#allocation3], 0  ;;  %s1300_s0 = inlined_call_operand.vmem [shape: f32[2,8,16], index: 0, kind: input, shape index: {}]   ;;  %s1301_s1 = inlined_call_operand.vmem [shape: bf16[16,192], index: 1, kind: input, shape index: {}]   ;;  %s1302_s2 = inlined_call_operand.vmem [shape: bf16[64,16], index: 2, kind: input, shape index: {}]   ;;  %s1303_s3 = inlined_call_operand.hbm [shape: f32[2,8,16], index: 3, kind: output, shape index: {}]  }
   0x1   :  { %10 = vsyncpa [#allocation3 + $0x1], 0  ;;  %s1108_s12 = smov 0   ;;  %s1110_s13 = smov 0  }
   0x2   :  { %s1112_s14 = smov 0   ;;  %s1114_s15 = smov 0  }
   0x3 LB: > { %s1129_s16 = sadd.s32 4294967295, %s1075_s15   ;;  %s836_s17 = sadd.s32 4294967294, %s1075_s15   ;;  %s1075_s15 = sphi %s1114_s15, %s1309_s15   ;;  %s1071_s14 = sphi %s1112_s14, %s1308_s14   ;;  %s1067_s13 = sphi %s1110_s13, %s1307_s13   ;;  %s1063_s12 = sphi %s1108_s12, %s1306_s12  }
   0x4   : > { %s1133_s18 = sadd.s32 1, %s1075_s15   ;;  %s91_s19 = sadd.s32 1, %s1071_s14 }
   0x5   : > { %s88_s20 = ssub.s32 %s1075_s15, %s1133_s18  ;;  %p101_p0 = scmp.ne.s32.totalorder %s1071_s14, %s1067_s13 }
   0x6   : > { %p89_p1 = scmp.eq.s32.totalorder %s88_s20, 0  ;;  %p102_p2 = scmp.eq.s32.totalorder %s1129_s16, 1 }
   0x7   : > { %p107_p3 = scmp.ne.s32.totalorder %s1067_s13, %s1063_s12  ;;  %p108_p4 = scmp.eq.s32.totalorder %s836_s17, 1 }
   0x8   : > { %s1144_s21 = scalar_select %p89_p1, %s1071_s14, %s91_s19  }
   0x9   : > { %p1146_p5 = por %p102_p2, %p101_p0  ;;  %p1150_p6 = por %p108_p4, %p107_p3 }
   0xa   : > { %p839_p7 = scmp.ge.s32.totalorder %s1075_s15, 1  ;;  %p139_p8 = scmp.lt.s32.totalorder %s1075_s15, 3 }
   0xc   : > { %p140_p9 = pnand %p839_p7, %p139_p8 }
   0xd   : > { %p162_p10 = scmp.lt.s32.totalorder (!%p140_p9), %s1129_s16, 1  ;;  %s1080_s6 = smov (!%p140_p9), 112  }
   0xe   : > { %143 = sbr.rel (%p140_p9) target bundleno = 1428 (0x594), region = 32  ;;  %s1081_s7 = smov (!%p140_p9), 64  }
   0xf   : > { %s1082_s8 = smov (!%p140_p9), 32   ;;  %s1083_s9 = smov (!%p140_p9), 48  }
  0x10   : > { %s1084_s10 = smov (!%p140_p9), 16   ;;  %s1085_s11 = smov (!%p140_p9), 96  }
  0x11   : > { %s1086_s17 = smov (!%p140_p9), 80   ;;  %s159_s30 = sand.u32 (!%p140_p9), 1, %s1067_s13  }
  0x12   : > { %s840_s4 = sshll.u32 (!%p140_p9), %s159_s30, 3 }
  0x13   : > { %v992_v0 = vld [vmem:[%s1301_s1 + $0x4] ss:$8 sps:$4 sm:$0xff]   ;;  %v994_v1 = vld [vmem:[%s1301_s1] ss:$8 sps:$4 sm:$0xff]   ;;  %v1077_v2 = vmov 0   ;;  %s163_s28 = scalar_select %p162_p10, %s1129_s16, 1 }
  0x14   : > { %225 = vmatprep.mubr.bf16.mxu0 %v1077_v2  ;;  %207 = vmatprep.subr.bf16.mxu0 %v992_v0  ;;  %vm189_vm0 = vcmask 130048   ;;  %v1078_v5 = vmov 0.0   ;;  %vm1079_vm1 = vmmov 0   ;;  %vm301_vm2 = vcmask 1043456  }
  0x15   : > { %208 = vmatpush1.bf16.msra.mxu0 %v994_v1  ;;  %s841_s29 = sshll.u32 %s163_s28, 3  ;;  %895 = vmatprep.subr.bf16.mxu1 %v1078_v5  ;;  %vm285_vm3 = vcmask 64512   ;;  %vm689_vm4 = vcmask 261120   ;;  %vm691_vm5 = vcmask 392192   ;;  %vm718_vm6 = vcmask 523264  }
  0x16   : > { %s165_s5 = scalar_lea.vmem %s1300_s0, %s841_s29  ;;  %883 = vmatprep.subr.bf16.mxu0 %v1078_v5  ;;  %897 = vmatprep.mubr.msk.bf16.mxu1 %vm1079_vm1, %v1078_v5 }
  0x17   : > { %v167_v3 = vld [vmem:[%s165_s5] sm:$0xff]  ;;  %s859_s5 = sshll.u32 %s1129_s16, 7  ;;  %s1087_s16 = smov [#allocation2]  }
  0x18   : > { %v168_v4 = vpack.c.bf16 %v167_v3, %v167_v3  ;;  %s1019_s19 = sshll.u32 %s1087_s16, 4  ;;  %s1020_s19 = int_to_ptr.vmem [resolvable:$false] %s1019_s19 }
  0x19   : > { %s1021_s20 = scalar_lea.vmem %s1020_s19, 256 }
  0x1a   : > { %844 = vmatmul.mubr.msk.bf16.vlgmr.msra.gmra.mxu0 %vm189_vm0, %v168_v4 }
  0x1b   : > { %885 = vmatprep.mubr.msk.bf16.mxu0 %vm1079_vm1, %v1078_v5 }
  0xda   : > { %v227_v6 = vpop.f32.mrf.mxu0 }
  0xdb   : > { %v234_v7 = vpack.c.bf16 %v227_v6, %v227_v6 }
  0xdc   : > { %v229_v8 = vpop.f32.mrf.mxu0 }
  0xdd   : > { %345 = vrot.lane.b32.xlu1 %v234_v7, %s1080_s6  ;;  %237 = vrot.lane.b32.xlu0 %v234_v7, %s1081_s7  ;;  %v1182_v15 = vpack.c.bf16 %v229_v8, %v229_v8 }
  0xde   : > { %v231_v9 = vpop.f32.mrf.mxu0 }
  0xdf   : > { %v303_v17 = vsel %vm301_vm2, %v1182_v15, 0 }
  0xe0   : > { %v232_v10 = vpop.f32.mrf.mxu0 }
  0xe1   : > { %458 = vrot.lane.b32.xlu1 %v234_v7, %s1082_s8  ;;  %347 = vrot.lane.b32.xlu0 %v234_v7, %s1083_s9 }
  0xe5   : > { %568 = vrot.lane.b32.xlu1 %v234_v7, %s1084_s10  ;;  %456 = vrot.lane.b32.xlu0 %v234_v7, %s1085_s11 }
  0xe9   : > { %566 = vrot.lane.b32.xlu0 %v234_v7, %s1086_s17 }
 0x14f   : > { %v238_v11 = vpop.permute.xlu0 %237  ;;  %v346_v13 = vpop.permute.xlu1 %345 }
 0x150   : > { %v243_v12 = vsel %vm189_vm0, %v238_v11, 0 }
 0x151   : > { %884 = vmatpush3.bf16.xpose.msra.mxu0 %v243_v12 }
 0x152   : > { %889 = vmatprep.subr.bf16.mxu0 %v1078_v5 }
 0x153   : > { %v348_v14 = vpop.permute.xlu0 %347  ;;  %v459_v18 = vpop.permute.xlu1 %458 }
 0x154   : > { %v353_v16 = vsel %vm189_vm0, %v348_v14, 0  ;;  %v464_v19 = vsel %vm189_vm0, %v459_v18, 0 }
 0x155   : > { %896 = vmatpush3.bf16.xpose.msra.mxu1 %v353_v16 }
 0x156   : > { %907 = vmatprep.subr.bf16.mxu1 %v1078_v5 }
 0x157   : > { %v569_v20 = vpop.permute.xlu1 %568  ;;  %v457_v21 = vpop.permute.xlu0 %456 }
 0x158   : > { %886 = vmatmul.mubr.msk.bf16.vlgmr.msra.gmra.mxu0 %vm189_vm0, %v234_v7  ;;  %v574_v22 = vsel %vm189_vm0, %v569_v20, 0 }
 0x159   : > { %890 = vmatpush3.bf16.msra.mxu0 %v303_v17  ;;  %891 = vmatprep.mubr.msk.bf16.mxu0 %vm1079_vm1, %v1078_v5 }
 0x15a   : > { %901 = vmatprep.subr.bf16.mxu0 %v1078_v5 }
 0x15b   : > { %v567_v23 = vpop.permute.xlu0 %566 }
 0x15c   : > { %898 = vmatmul.mubr.msk.bf16.vlgmr.msra.gmra.mxu1 %vm189_vm0, %v346_v13 }
 0x15d   : > { %908 = vmatpush3.bf16.xpose.msra.mxu1 %v464_v19  ;;  %909 = vmatprep.mubr.msk.bf16.mxu1 %vm1079_vm1, %v1078_v5 }
 0x15e   : > { %919 = vmatprep.subr.bf16.mxu1 %v1078_v5 }
 0x164   : > { %910 = vmatmul.mubr.msk.bf16.vlgmr.msra.gmra.mxu1 %vm189_vm0, %v457_v21 }
 0x165   : > { %920 = vmatpush3.bf16.xpose.msra.mxu1 %v574_v22  ;;  %921 = vmatprep.mubr.msk.bf16.mxu1 %vm1079_vm1, %v1078_v5 }
 0x166   : > { %931 = vmatprep.subr.bf16.mxu1 %v1078_v5 }
 0x16c   : > { %922 = vmatmul.mubr.msk.bf16.vlgmr.msra.gmra.mxu1 %vm189_vm0, %v567_v23 }
 0x16d   : > { %939 = vmatprep.mubr.msk.bf16.mxu1 %vm1079_vm1, %v1078_v5 }
 0x218   : > { %v279_v24 = vpop.f32.mrf.mxu0 }
 0x219   : > { %v286_v25 = vsel %vm285_vm3, %v279_v24, -inf }
 0x21a   : > { %287 = vmax.xlane.f32.xlu1 %v286_v25  ;;  %v887_v26 = vpop.f32.mrf.mxu0 }
 0x21b   : > { %v995_v26 = vld [vmem:[%s1302_s2 + $0x18] sm:$0xff]  }
 0x21c   : > { %v282_v27 = vpop.f32.mrf.mxu0  ;;  %v389_v28 = vpop.f32.mrf.mxu1  ;;  %932 = vmatpush3.bf16.msra.mxu1 %v995_v26 }
 0x21d   : > { %v395_v29 = vsel %vm285_vm3, %v389_v28, -inf  ;;  %933 = vmatprep.subr.bf16.mxu1 %v1078_v5 }
 0x21e   : > { %396 = vmax.xlane.f32.xlu0 %v395_v29  ;;  %v888_v30 = vpop.f32.mrf.mxu0  ;;  %v899_v31 = vpop.f32.mrf.mxu1 }
 0x21f   : > { %v997_v31 = vld [vmem:[%s1302_s2 + $0x8] sm:$0xff]  }
 0x220   : > { %v392_v32 = vpop.f32.mrf.mxu1 }
 0x222   : > { %v900_v33 = vpop.f32.mrf.mxu1 }
 0x224   : > { %v500_v34 = vpop.f32.mrf.mxu1 }
 0x225   : > { %v506_v35 = vsel %vm285_vm3, %v500_v34, -inf }
 0x226   : > { %507 = vmax.xlane.f32.xlu0 %v506_v35  ;;  %v911_v36 = vpop.f32.mrf.mxu1 }
 0x228   : > { %v503_v37 = vpop.f32.mrf.mxu1 }
 0x22a   : > { %v912_v38 = vpop.f32.mrf.mxu1 }
 0x22b   : > { %v998_v38 = vld [vmem:[%s1302_s2] sm:$0xff]  }
 0x22c   : > { %v610_v39 = vpop.f32.mrf.mxu1 }
 0x22d   : > { %v616_v40 = vsel %vm285_vm3, %v610_v39, -inf }
 0x22e   : > { %v923_v41 = vpop.f32.mrf.mxu1  ;;  %617 = vmax.xlane.f32.xlu1 %v616_v40 }
 0x230   : > { %v613_v42 = vpop.f32.mrf.mxu1 }
 0x232   : > { %v924_v43 = vpop.f32.mrf.mxu1 }
 0x2a3   : > { %v288_v44 = vpop.xlane.xlu1 %287 }
 0x2a4   : > { %v289_v45 = vsub.f32 %v279_v24, %v288_v44 }
 0x2a6   : > { %v290_v46 = vmul.f32 1.442695, %v289_v45 }
 0x2a7   : > { %v397_v47 = vpop.xlane.xlu0 %396 }
 0x2a8   : > { %999 = vpow2.f32 %v290_v46  ;;  %v398_v48 = vsub.f32 %v389_v28, %v397_v47  ;;  %v996_v28 = vld [vmem:[%s1302_s2 + $0x10] sm:$0xff]  }
 0x2a9   : > { %934 = vmatpush3.bf16.msra.mxu1 %v996_v28 }
 0x2aa   : > { %v399_v49 = vmul.f32 1.442695, %v398_v48  ;;  %935 = vmatprep.subr.bf16.mxu1 %v1078_v5 }
 0x2ac   : > { %1001 = vpow2.f32 %v399_v49 }
 0x2ad   : > { %936 = vmatpush3.bf16.msra.mxu1 %v997_v31 }
 0x2ae   : > { %937 = vmatprep.subr.bf16.mxu1 %v1078_v5 }
 0x2af   : > { %v508_v50 = vpop.xlane.xlu0 %507 }
 0x2b0   : > { %v509_v51 = vsub.f32 %v500_v34, %v508_v50 }
 0x2b1   : > { %938 = vmatpush3.bf16.msra.mxu1 %v998_v38 }
 0x2b2   : > { %v510_v52 = vmul.f32 1.442695, %v509_v51 }
 0x2b4   : > { %1003 = vpow2.f32 %v510_v52 }
 0x2b5   : > { %v1000_v53 = vpop.eup %999 }
 0x2b6   : > { %v292_v54 = vsel %vm285_vm3, %v1000_v53, 0.0 }
 0x2b7   : > { %293 = vadd.xlane.f32.xlu0 %v292_v54  ;;  %v618_v59 = vpop.xlane.xlu1 %617 }
 0x2b8   : > { %v619_v60 = vsub.f32 %v610_v39, %v618_v59 }
 0x2b9   : > { %v1002_v55 = vpop.eup %1001 }
 0x2ba   : > { %v401_v56 = vsel %vm285_vm3, %v1002_v55, 0.0  ;;  %v620_v61 = vmul.f32 1.442695, %v619_v60 }
 0x2bb   : > { %402 = vadd.xlane.f32.xlu1 %v401_v56 }
 0x2bc   : > { %1005 = vpow2.f32 %v620_v61 }
 0x2c1   : > { %v1004_v57 = vpop.eup %1003 }
 0x2c2   : > { %v512_v58 = vsel %vm285_vm3, %v1004_v57, 0.0 }
 0x2c3   : > { %513 = vadd.xlane.f32.xlu0 %v512_v58 }
 0x2c9   : > { %v1006_v62 = vpop.eup %1005 }
 0x2ca   : > { %v622_v63 = vsel %vm285_vm3, %v1006_v62, 0.0 }
 0x2cc   : > { %518 = vrot.lane.b32.xlu1 %v1182_v15, %s1085_s11  ;;  %s764_s11 = scalar_lea.sflag [#allocation3], %s159_s30 }
 0x2d9   : > { %408 = vrot.lane.b32.xlu0 %v1182_v15, %s1080_s6  ;;  %s161_s6 = scalar_lea.vmem [#allocation2], %s840_s4 }
 0x2da   : > { %s777_s7 = sshll.u32 %s161_s6, 4  ;;  %s1260_s7 = int_to_ptr.vmem [resolvable:$true] %s777_s7 }
 0x2db   : > { %p1022_p0 = scmp.lt.s32.totalorder %s1260_s7, %s1020_s19 }
 0x2f0   : > { %623 = vadd.xlane.f32.xlu1 %v622_v63 }
 0x301   : > { %628 = vrot.lane.b32.xlu1 %v1182_v15, %s1086_s17  ;;  %s1015_s17 = scalar_lea.vmem %s1260_s7, 128 }
 0x302   : > { %p1016_p11 = scmp.ne.s32.totalorder %s1260_s7, %s1015_s17  ;;  %p1023_p1 = scmp.lt.s32.totalorder %s1021_s20, %s1015_s17 }
 0x304   : > { %p1017_p12 = pnand %p1016_p11, %p1146_p5  ;;  %p1024_p2 = por %p1023_p1, %p1022_p0 }
 0x306   : > { %p1018_p13 = pneg %p1017_p12 }
 0x308   : > { %p1025_p3 = pnand %p1024_p2, %p1018_p13 }
 0x340   : > { %v294_v0 = vpop.xlane.xlu0 %293 }
 0x341   : > { %1007 = vrcp.f32 %v294_v0 }
 0x344   : > { %v403_v1 = vpop.xlane.xlu1 %402 }
 0x345   : > { %1009 = vrcp.f32 %v403_v1 }
 0x348   : > { %v519_v11 = vpop.permute.xlu1 %518 }
 0x349   : > { %v524_v14 = vsel %vm301_vm2, %v519_v11, 0 }
 0x34c   : > { %v514_v2 = vpop.xlane.xlu0 %513 }
 0x34d   : > { %1011 = vrcp.f32 %v514_v2 }
 0x34e   : > { %v1008_v3 = vpop.eup %1007 }
 0x34f   : > { %v296_v4 = vmul.f32 %v1008_v3, %v1000_v53 }
 0x350   : > { %v409_v6 = vpop.permute.xlu0 %408 }
 0x351   : > { %v414_v7 = vsel %vm301_vm2, %v409_v6, 0  ;;  %v297_v8 = vpack.c.bf16 %v296_v4, %v296_v4 }
 0x352   : > { %v1010_v9 = vpop.eup %1009 }
 0x353   : > { %892 = vmatmul.mubr.msk.bf16.vlgmr.msra.gmra.mxu0 %vm285_vm3, %v297_v8  ;;  %v405_v10 = vmul.f32 %v1010_v9, %v1002_v55 }
 0x354   : > { %902 = vmatpush3.bf16.msra.mxu0 %v414_v7  ;;  %903 = vmatprep.mubr.msk.bf16.mxu0 %vm1079_vm1, %v1078_v5 }
 0x355   : > { %913 = vmatprep.subr.bf16.mxu0 %v1078_v5  ;;  %v406_v12 = vpack.c.bf16 %v405_v10, %v405_v10 }
 0x35a   : > { %v1012_v13 = vpop.eup %1011 }
 0x35b   : > { %904 = vmatmul.mubr.msk.bf16.vlgmr.msra.gmra.mxu0 %vm285_vm3, %v406_v12  ;;  %v516_v15 = vmul.f32 %v1012_v13, %v1004_v57 }
 0x35c   : > { %914 = vmatpush3.bf16.msra.mxu0 %v524_v14  ;;  %915 = vmatprep.mubr.msk.bf16.mxu0 %vm1079_vm1, %v1078_v5 }
 0x35d   : > { %925 = vmatprep.subr.bf16.mxu0 %v1078_v5  ;;  %v517_v16 = vpack.c.bf16 %v516_v15, %v516_v15 }
 0x363   : > { %916 = vmatmul.mubr.msk.bf16.vlgmr.msra.gmra.mxu0 %vm285_vm3, %v517_v16 }
 0x364   : > { %927 = vmatprep.mubr.msk.bf16.mxu0 %vm1079_vm1, %v1078_v5 }
 0x379   : > { %v624_v17 = vpop.xlane.xlu1 %623 }
 0x37a   : > { %1013 = vrcp.f32 %v624_v17 }
 0x37d   : > { %v629_v18 = vpop.permute.xlu1 %628 }
 0x37e   : > { %v634_v19 = vsel %vm301_vm2, %v629_v18, 0 }
 0x37f   : > { %926 = vmatpush3.bf16.msra.mxu0 %v634_v19 }
 0x387   : > { %v1014_v20 = vpop.eup %1013 }
 0x388   : > { %v626_v21 = vmul.f32 %v1014_v20, %v1006_v62 }
 0x38a   : > { %v627_v22 = vpack.c.bf16 %v626_v21, %v626_v21 }
 0x38c   : > { %928 = vmatmul.mubr.msk.bf16.vlgmr.msra.gmra.mxu0 %vm285_vm3, %v627_v22 }
 0x413   : > { %v339_v23 = vpop.f32.mrf.mxu0 }
 0x415   : > { %v893_v24 = vpop.f32.mrf.mxu0 }
 0x417   : > { %v342_v25 = vpop.f32.mrf.mxu0 }
 0x419   : > { %v894_v27 = vpop.f32.mrf.mxu0 }
 0x41b   : > { %v450_v29 = vpop.f32.mrf.mxu0 }
 0x41c   : > { %677 = vrot.lane.b32.xlu0 %v450_v29, %s1084_s10  ;;  %s1258_s10 = scalar_lea.hbm %s1303_s3, %s859_s5 }
 0x41d   : > { %v905_v30 = vpop.f32.mrf.mxu0 }
 0x41f   : > { %v453_v32 = vpop.f32.mrf.mxu0 }
 0x421   : > { %v906_v33 = vpop.f32.mrf.mxu0 }
 0x423   : > { %v560_v34 = vpop.f32.mrf.mxu0 }
 0x424   : > { %681 = vrot.lane.b32.xlu1 %v560_v34, %s1082_s8 }
 0x425   : > { %v917_v35 = vpop.f32.mrf.mxu0 }
 0x427   : > { %v563_v36 = vpop.f32.mrf.mxu0 }
 0x429   : > { %v918_v37 = vpop.f32.mrf.mxu0 }
 0x44c   : > { %v670_v39 = vpop.f32.mrf.mxu0 }
 0x44d   : > { %685 = vrot.lane.b32.xlu0 %v670_v39, %s1083_s9 }
 0x44e   : > { %v929_v40 = vpop.f32.mrf.mxu0 }
 0x450   : > { %v673_v41 = vpop.f32.mrf.mxu0 }
 0x452   : > { %v930_v42 = vpop.f32.mrf.mxu0 }
 0x48e   : > { %v678_v5 = vpop.permute.xlu0 %677 }
 0x48f   : > { %v688_v44 = vsel %vm189_vm0, %v339_v23, %v678_v5 }
 0x496   : > { %v682_v43 = vpop.permute.xlu1 %681 }
 0x497   : > { %v690_v45 = vsel %vm689_vm4, %v688_v44, %v682_v43 }
 0x4bf   : > { %v686_v46 = vpop.permute.xlu0 %685 }
 0x4c0   : > { %v692_v47 = vsel %vm691_vm5, %v690_v45, %v686_v46 }
 0x4c1   : > { %v693_v48 = vpack.c.bf16 %v692_v47, %v692_v47 }
 0x4c3   : > { %940 = vmatmul.mubr.msk.bf16.vlgmr.msra.gmra.mxu1 %vm718_vm6, %v693_v48 }
 0x583   : > { %v756_v49 = vpop.f32.mrf.mxu1 }
 0x584   : > { %762 = vst.msk [vmem:[%s161_s6] sm:$0xff] %vm189_vm0, %v756_v49 }
 0x585   : > { %v941_v50 = vpop.f32.mrf.mxu1 }
 0x586   : > { %1028 = shalt.err (!%p1025_p3)
}
 0x587   : > { %s1029_s24 = scalar_lea.hbm %s1258_s10, 128  ;;  %s1033_s27 = scalar_lea.hbm %s1303_s3, 256 }
 0x588   : > { %p1030_p4 = scmp.ne.s32.totalorder %s1258_s10, %s1029_s24  ;;  %p1034_p9 = scmp.lt.s32.totalorder %s1258_s10, %s1303_s3 }
 0x589   : > { %p1035_p10 = scmp.lt.s32.totalorder %s1033_s27, %s1029_s24 }
 0x58a   : > { %p1031_p7 = pnand %p1030_p4, %p1146_p5 }
 0x58b   : > { %p1036_p11 = por %p1035_p10, %p1034_p9 }
 0x58c   : > { %p1032_p8 = pneg %p1031_p7 }
 0x58e   : > { %p1037_p12 = pnand %p1036_p11, %p1032_p8 }
 0x590   : > { %1040 = shalt.err (!%p1037_p12)
}
 0x591   : > { %943 = dma.vmem_to_hbm [thread:$0]  (%p1146_p5), %s1260_s7, 128, %s1258_s10, %s764_s11   ;;  %v759_v51 = vpop.f32.mrf.mxu1 }
 0x593   : > { %v942_v52 = vpop.f32.mrf.mxu1 }
 0x594 PF: > { %p949_p13 = scmp.ge.s32.totalorder %s1075_s15, 2  ;;  %s789_s30 = sand.u32 1, %s1063_s12  }
 0x595   : > { %s790_s4 = scalar_lea.sflag [#allocation3], %s789_s30 }
 0x596   : > { %p946_p0 = pnand %p949_p13, %p1150_p6 }
 0x598   : > { %p947_p1 = pneg %p946_p0 }
 0x59a   : > { %1058 = dma.done.wait (%p947_p1), %s790_s4, 128  }
 0x59b   : > { %1060 = vsyncadd (%p947_p1), %s790_s4, 4294967168  ;;  %p13_p5 = scmp.ge.s32.totalorder %s1133_s18, 4   ;;  %s1306_s12 = smov %s1067_s13 }
 0x59c   : > { %s1307_s13 = smov %s1071_s14  ;;  %s1308_s14 = smov %s1144_s21 }
 0x59d   : > { %s1309_s15 = smov %s1133_s18  ;;  %15 = sbr.rel (!%p13_p5) target bundleno = 3 (0x3), region = 67 }
 0x5a2   :  { %795 = vsyncpa [#allocation3], 1 }
 0x5a3   :  { %797 = vsyncpa [#allocation3 + $0x1], 1 }

</bundles_post_ra>
